<compile_context>
chip_gen: v6e
topology: v6e:2x2x1
jax: 0.10.0
libtpu: 0.0.40
codegen_flags: <defaults>
</compile_context>

<pallas_src>
import functools

import numpy as np
import jax
import jax.numpy as jnp
from jax.experimental import pallas as pl
from jax.experimental.pallas import tpu as pltpu


# --------------------------------------------------------------------------------------
# 1x1 (pointwise) Conv2d
# --------------------------------------------------------------------------------------
def _pointwise_conv_vpu_kernel(x_ref, w_ref, b_ref, o_ref):
    """Small-channel path: unrolled VPU broadcast-FMA contraction (no MXU)."""
    # x_ref: (C_in, T)  w_ref: (C_out, C_in)  b_ref: (C_out, 1)  o_ref: (C_out, T)
    x = x_ref[...].astype(jnp.float32)
    w = w_ref[...].astype(jnp.float32)
    c_in = x_ref.shape[0]
    acc = w[:, 0:1] * x[0:1, :]
    for ic in range(1, c_in):                      # static unroll; C_in is tiny here
        acc = acc + w[:, ic:ic + 1] * x[ic:ic + 1, :]
    o_ref[...] = (acc + b_ref[...].astype(jnp.float32)).astype(o_ref.dtype)


def _pointwise_conv_mxu_kernel(x_ref, w_ref, b_ref, o_ref):
    """General path: (C_out, C_in) @ (C_in, T) on the MXU, f32 accumulation."""
    acc = jnp.dot(w_ref[...], x_ref[...], preferred_element_type=jnp.float32)
    o_ref[...] = (acc + b_ref[...].astype(jnp.float32)).astype(o_ref.dtype)


def _pick_hw_tile(hw, c_in, c_out, itemsize, vmem_budget_bytes):
    """Largest legal HW tile whose double-buffered in+out tiles fit the VMEM budget."""
    per_col = 2 * (c_in + c_out) * max(itemsize, 4)   # double-buffered input + output
    max_cols = max(128, vmem_budget_bytes // per_col)
    if hw <= max_cols:
        return hw                       # whole image per grid step (always layout-legal)
    return (max_cols // 128) * 128      # multiple of 128; last partial block is masked


def pointwise_conv2d(x_nchw, weight, bias=None, *, hw_tile=None,
                     vmem_budget_bytes=8 << 20):
    """1x1 Conv2d forward (PyTorch semantics), NCHW in / NCHW out.

    x_nchw : (N, C_in, H, W)
    weight : (C_out, C_in, 1, 1)   -- PyTorch Conv2d weight layout
    bias   : (C_out,) or None
    """
    N, C_in, H, W = x_nchw.shape
    C_out = weight.shape[0]
    HW = H * W

    x_flat = x_nchw.reshape(N, C_in, HW)            # NCHW flatten: no data movement
    w_mat = weight.reshape(C_out, C_in)
    if bias is None:
        bias = jnp.zeros((C_out,), dtype=x_nchw.dtype)
    b_mat = bias.reshape(C_out, 1)

    if hw_tile is None:
        hw_tile = _pick_hw_tile(HW, C_in, C_out,
                                jnp.dtype(x_nchw.dtype).itemsize,
                                vmem_budget_bytes)
    n_hw = pl.cdiv(HW, hw_tile)

    small = (C_in <= 16) and (C_out <= 16)
    kernel = _pointwise_conv_vpu_kernel if small else _pointwise_conv_mxu_kernel

    out = pl.pallas_call(
        kernel,
        out_shape=jax.ShapeDtypeStruct((N, C_out, HW), x_nchw.dtype),
        grid_spec=pltpu.PrefetchScalarGridSpec(
            num_scalar_prefetch=0,
            grid=(N, n_hw),
            in_specs=[
                pl.BlockSpec((None, C_in, hw_tile), lambda n, j: (n, 0, j)),  # x tile
                pl.BlockSpec((C_out, C_in), lambda n, j: (0, 0)),             # full W
                pl.BlockSpec((C_out, 1), lambda n, j: (0, 0)),                # bias
            ],
            out_specs=pl.BlockSpec((None, C_out, hw_tile), lambda n, j: (n, 0, j)),
        ),
        compiler_params=pltpu.CompilerParams(
            dimension_semantics=("parallel", "parallel"),
        ),
    )(x_flat, w_mat, b_mat)

    return out.reshape(N, C_out, H, W)              # already NCHW: no transpose


# --------------------------------------------------------------------------------------
# Fused BN(eval) + ReLU + 1x1 conv (bias=False) + residual add
#   residue = x ; out = relu(bn(x)) ; out = conv1x1(out) ; out += residue
# --------------------------------------------------------------------------------------
def _bn_relu_pw_res_kernel(x_ref, scale_ref, shift_ref, w_ref, o_ref):
    # x_ref: (C, T)  scale/shift: (C, 1)  w_ref: (C, C)  o_ref: (C, T)
    x = x_ref[...].astype(jnp.float32)
    act = jnp.maximum(scale_ref[...] * x + shift_ref[...], 0.0)        # BN + ReLU
    y = jnp.dot(w_ref[...].astype(jnp.float32), act,
                preferred_element_type=jnp.float32)                    # 1x1 conv (MXU)
    o_ref[...] = (y + x).astype(o_ref.dtype)                           # residual add


def bn_relu_pwconv_residual(x_nchw, bn_scale, bn_shift, weight, *, hw_tile=None,
                            vmem_budget_bytes=8 << 20):
    """Fused `mlp` tail of BasicTransBlock / BasicTransDecoderBlock (inference-mode BN).

    bn_scale = gamma / sqrt(running_var + eps)
    bn_shift = beta - running_mean * bn_scale
    weight   : (C, C, 1, 1)
    """
    N, C, H, W = x_nchw.shape
    assert weight.shape[0] == weight.shape[1] == C
    HW = H * W
    x_flat = x_nchw.reshape(N, C, HW)
    w_mat = weight.reshape(C, C)
    scale = bn_scale.reshape(C, 1).astype(jnp.float32)
    shift = bn_shift.reshape(C, 1).astype(jnp.float32)

    if hw_tile is None:
        hw_tile = _pick_hw_tile(HW, C, C, jnp.dtype(x_nchw.dtype).itemsize,
                                vmem_budget_bytes)
    n_hw = pl.cdiv(HW, hw_tile)

    out = pl.pallas_call(
        _bn_relu_pw_res_kernel,
        out_shape=jax.ShapeDtypeStruct((N, C, HW), x_nchw.dtype),
        grid_spec=pltpu.PrefetchScalarGridSpec(
            num_scalar_prefetch=0,
            grid=(N, n_hw),
            in_specs=[
                pl.BlockSpec((None, C, hw_tile), lambda n, j: (n, 0, j)),  # x tile
                pl.BlockSpec((C, 1), lambda n, j: (0, 0)),                 # BN scale
                pl.BlockSpec((C, 1), lambda n, j: (0, 0)),                 # BN shift
                pl.BlockSpec((C, C), lambda n, j: (0, 0)),                 # conv weight
            ],
            out_specs=pl.BlockSpec((None, C, hw_tile), lambda n, j: (n, 0, j)),
        ),
        compiler_params=pltpu.CompilerParams(
            dimension_semantics=("parallel", "parallel"),
        ),
    )(x_flat, scale, shift, w_mat)

    return out.reshape(N, C, H, W)


# --------------------------------------------------------------------------------------
# Cross-attention core: scores = q·kᵀ + rel_bias ; *scale ; softmax ; out = attn·v
# --------------------------------------------------------------------------------------
def _attn_kernel(q_ref, k_ref, v_ref, bias_ref, o_ref, *, scale):
    # q_ref: (tq, d)  k_ref/v_ref: (Nk, d)  bias_ref: (tq, Nk)  o_ref: (tq, d)
    q = q_ref[...].astype(jnp.float32)
    k = k_ref[...].astype(jnp.float32)
    s = jax.lax.dot_general(q, k, (((1,), (1,)), ((), ())),
                            preferred_element_type=jnp.float32)        # (tq, Nk)
    s = (s + bias_ref[...].astype(jnp.float32)) * scale                # bias BEFORE scale
    m = jnp.max(s, axis=-1, keepdims=True)
    p = jnp.exp(s - m)
    l = jnp.sum(p, axis=-1, keepdims=True)
    attn = p * pl.reciprocal(l, approx=True)                           # EUP recip
    o = jnp.dot(attn, v_ref[...].astype(jnp.float32),
                preferred_element_type=jnp.float32)                    # (tq, d)
    o_ref[...] = o.astype(o_ref.dtype)


def _pick_q_tile(nq, nk, d, vmem_budget_bytes):
    per_row = 4 * (2 * (d + nk + d) + nk)          # double-buffered q/bias/out + scores
    max_rows = max(128, vmem_budget_bytes // max(per_row, 1))
    if nq <= max_rows:
        return nq
    return (max_rows // 128) * 128


def decoder_cross_attention(q, k, v, rel_bias, *, scale, q_tile=None,
                            vmem_budget_bytes=8 << 20):
    """Attention core of LinearAttentionDecoder / LinearAttention.

    q        : (B, heads, Nq, d)
    k, v     : (B, heads, Nk, d)      (Nk = reduce_size**2)
    rel_bias : (heads, Nq, Nk)        (relative position bias, shared over batch)
    Returns  : (B, heads, Nq, d)      (== torch.einsum('bhij,bhjd->bhid', softmax, v))
    """
    B, Hh, Nq, d = q.shape
    Nk = k.shape[2]
    if q_tile is None:
        q_tile = _pick_q_tile(Nq, Nk, d, vmem_budget_bytes)
    n_q = pl.cdiv(Nq, q_tile)

    kernel = functools.partial(_attn_kernel, scale=scale)
    out = pl.pallas_call(
        kernel,
        out_shape=jax.ShapeDtypeStruct((B, Hh, Nq, d), q.dtype),
        grid_spec=pltpu.PrefetchScalarGridSpec(
            num_scalar_prefetch=0,
            grid=(B, Hh, n_q),
            in_specs=[
                pl.BlockSpec((None, None, q_tile, d), lambda b, h, i: (b, h, i, 0)),
                pl.BlockSpec((None, None, Nk, d), lambda b, h, i: (b, h, 0, 0)),
                pl.BlockSpec((None, None, Nk, d), lambda b, h, i: (b, h, 0, 0)),
                pl.BlockSpec((None, q_tile, Nk), lambda b, h, i: (h, i, 0)),
            ],
            out_specs=pl.BlockSpec((None, None, q_tile, d),
                                   lambda b, h, i: (b, h, i, 0)),
        ),
        compiler_params=pltpu.CompilerParams(
            dimension_semantics=("parallel", "parallel", "parallel"),
        ),
    )(q, k, v, rel_bias)
    return out


# --------------------------------------------------------------------------------------
# Relative position bias (parameter preprocessing, plain JAX -- matches RelativePositionBias)
# --------------------------------------------------------------------------------------
def make_relative_position_index(h, w):
    coords = np.stack(np.meshgrid(np.arange(h), np.arange(w), indexing="ij"))   # (2,h,w)
    coords_flatten = coords.reshape(2, -1)                                       # (2,hw)
    rel = coords_flatten[:, :, None] - coords_flatten[:, None, :]                # (2,hw,hw)
    rel = rel.transpose(1, 2, 0).astype(np.int64)                                # (hw,hw,2)
    rel[..., 0] += h - 1
    rel[..., 1] += w - 1
    rel[..., 0] *= 2 * h - 1
    return jnp.asarray(rel.sum(-1).astype(np.int32))                             # (hw,hw)


def relative_position_bias(table, rel_index, H, W, h, w):
    """table: ((2h-1)*(2w-1), heads) -> (heads, H*W, h*w), incl. repeat_interleave expand."""
    heads = table.shape[-1]
    bias = table[rel_index.reshape(-1)].reshape(h, w, h * w, heads)
    bias = jnp.repeat(bias, H // h, axis=0)
    bias = jnp.repeat(bias, W // w, axis=1)
    return bias.reshape(H * W, h * w, heads).transpose(2, 0, 1)


# --------------------------------------------------------------------------------------
if __name__ == "__main__":
    key = jax.random.PRNGKey(0)
    keys = jax.random.split(key, 12)
    N, Hs, Ws = 2, 16, 16

    # --- 1) 1x1 conv, small channels (VPU path), whole-image tile --------------------
    C_in, C_out = 4, 3
    x = jax.random.normal(keys[0], (N, C_in, Hs, Ws), jnp.float32)
    bound = 1.0 / (C_in ** 0.5)
    w = jax.random.uniform(keys[1], (C_out, C_in, 1, 1), jnp.float32, -bound, bound)
    b = jax.random.uniform(keys[2], (C_out,), jnp.float32, -bound, bound)

    y = jax.block_until_ready(pointwise_conv2d(x, w, b))
    ref = (x[:, None] * w.reshape(C_out, C_in)[None, :, :, None, None]).sum(2) \
        + b[None, :, None, None]
    assert y.shape == (N, C_out, Hs, Ws)
    assert jnp.allclose(y, ref, atol=1e-5, rtol=1e-5)

    # --- 2) same problem, forced multi-tile HW grid ------------------------------------
    y_t = jax.block_until_ready(pointwise_conv2d(x, w, b, hw_tile=128))
    assert jnp.allclose(y_t, ref, atol=1e-5, rtol=1e-5)

    # --- 3) 1x1 conv, larger channels (MXU path) ----------------------------------------
    C2 = 64
    x2 = jax.random.normal(keys[3], (N, C2, Hs, Ws), jnp.float32)
    x2 = x2.astype(jnp.bfloat16).astype(jnp.float32)
    w2 = (jax.random.normal(keys[4], (C2, C2, 1, 1), jnp.float32) * 0.05)
    w2 = w2.astype(jnp.bfloat16).astype(jnp.float32)
    b2 = jax.random.normal(keys[5], (C2,), jnp.float32) * 0.05
    y2 = jax.block_until_ready(pointwise_conv2d(x2, w2, b2))
    ref2 = (x2[:, None] * w2.reshape(C2, C2)[None, :, :, None, None]).sum(2) \
         + b2[None, :, None, None]
    assert jnp.allclose(y2, ref2, atol=1e-4, rtol=1e-4)

    # --- 4) fused BN + ReLU + 1x1 conv + residual (mlp tail of the transformer blocks) -
    C3 = 32
    x3 = jax.random.normal(keys[6], (N, C3, Hs, Ws), jnp.float32)
    x3 = x3.astype(jnp.bfloat16).astype(jnp.float32)
    w3 = (jax.random.normal(keys[7], (C3, C3, 1, 1), jnp.float32) * 0.05)
    w3 = w3.astype(jnp.bfloat16).astype(jnp.float32)
    # power-of-two scales + zero shift keep the BN output exactly bf16-representable
    scale3 = 2.0 ** jax.random.randint(keys[8], (C3,), -1, 2).astype(jnp.float32)
    shift3 = jnp.zeros((C3,), jnp.float32)
    y3 = jax.block_until_ready(bn_relu_pwconv_residual(x3, scale3, shift3, w3))
    act3 = jnp.maximum(scale3[None, :, None, None] * x3 + shift3[None, :, None, None], 0.0)
    ref3 = (act3[:, None] * w3.reshape(C3, C3)[None, :, :, None, None]).sum(2) + x3
    assert y3.shape == x3.shape
    assert jnp.allclose(y3, ref3, atol=1e-4, rtol=1e-4)

    # general (non-exact-friendly) BN parameters, tolerant check
    scale3b = 1.0 + 0.1 * jax.random.normal(keys[9], (C3,), jnp.float32)
    shift3b = 0.1 * jax.random.normal(keys[10], (C3,), jnp.float32)
    y3b = jax.block_until_ready(bn_relu_pwconv_residual(x3, scale3b, shift3b, w3))
    act3b = jnp.maximum(scale3b[None, :, None, None] * x3
                        + shift3b[None, :, None, None], 0.0)
    ref3b = (act3b[:, None] * w3.reshape(C3, C3)[None, :, :, None, None]).sum(2) + x3
    assert jnp.allclose(y3b, ref3b, atol=1e-2, rtol=1e-2)

    # --- 5) cross-attention core (q·kᵀ + rel-pos bias -> softmax -> ·v) -----------------
    heads, out_ch, reduce_size = 4, 32, 8
    d_head = out_ch // heads                    # 8
    Nq, Nk = Hs * Ws, reduce_size * reduce_size  # 256, 64
    q4 = jax.random.normal(keys[11], (N, heads, Nq, d_head), jnp.float32)
    q4 = q4.astype(jnp.bfloat16).astype(jnp.float32)
    kkey, vkey, tkey = jax.random.split(jax.random.PRNGKey(1), 3)
    k4 = jax.random.normal(kkey, (N, heads, Nk, d_head), jnp.float32)
    k4 = k4.astype(jnp.bfloat16).astype(jnp.float32)
    v4 = jax.random.normal(vkey, (N, heads, Nk, d_head), jnp.float32)
    v4 = v4.astype(jnp.bfloat16).astype(jnp.float32)
    table = 0.02 * jax.random.normal(
        tkey, ((2 * reduce_size - 1) * (2 * reduce_size - 1), heads), jnp.float32)
    rel_index = make_relative_position_index(reduce_size, reduce_size)
    bias4 = relative_position_bias(table, rel_index, Hs, Ws, reduce_size, reduce_size)
    attn_scale = d_head ** (-0.5)

    y4 = jax.block_until_ready(
        decoder_cross_attention(q4, k4, v4, bias4, scale=attn_scale))

    s_ref = (q4[:, :, :, None, :] * k4[:, :, None, :, :]).sum(-1)       # (N,h,Nq,Nk)
    s_ref = (s_ref + bias4[None]) * attn_scale
    attn_ref = jax.nn.softmax(s_ref, axis=-1)
    o_ref = (attn_ref[..., None] * v4[:, :, None, :, :]).sum(-2)        # (N,h,Nq,d)
    assert y4.shape == o_ref.shape
    assert jnp.allclose(y4, o_ref, atol=2e-2, rtol=2e-2)

    print("KERNEL_OK")
</pallas_src>

<mosaic_0001>
module attributes {stable_mosaic.version = 11 : i64} {
  func.func @_pointwise_conv_vpu_kernel(%arg0: i32, %arg1: i32, %arg2: memref<1x4x256xf32, #tpu.memory_space<vmem>>, %arg3: memref<3x4xf32, #tpu.memory_space<vmem>>, %arg4: memref<3x1xf32, #tpu.memory_space<vmem>>, %arg5: memref<1x3x256xf32, #tpu.memory_space<vmem>>) attributes {dimension_semantics = [#tpu.dimension_semantics<parallel>, #tpu.dimension_semantics<parallel>], iteration_bounds = array<i64: 2, 1>, scalar_prefetch = 0 : i64, scratch_operands = 0 : i64, tpu.core_type = #tpu.core_type<tc>, window_params = [{transform_indices = @transform_0, window_bounds = array<i64: 1, 4, 256>}, {pipeline_mode = #tpu.pipeline_mode<synchronous>, transform_indices = @transform_1, window_bounds = array<i64: 3, 4>}, {pipeline_mode = #tpu.pipeline_mode<synchronous>, transform_indices = @transform_2, window_bounds = array<i64: 3, 1>}, {transform_indices = @transform_3, window_bounds = array<i64: 1, 3, 256>}]} {
    %c0 = arith.constant 0 : index
    %c0_0 = arith.constant 0 : index
    %c0_1 = arith.constant 0 : index
    %0 = vector.load %arg2[%c0, %c0_0, %c0_1] : memref<1x4x256xf32, #tpu.memory_space<vmem>>, vector<1x4x256xf32>
    %1 = vector.shape_cast %0 : vector<1x4x256xf32> to vector<4x256xf32>
    %c0_2 = arith.constant 0 : index
    %c0_3 = arith.constant 0 : index
    %2 = vector.load %arg3[%c0_2, %c0_3] : memref<3x4xf32, #tpu.memory_space<vmem>>, vector<3x4xf32>
    %3 = vector.extract_strided_slice %2 {offsets = [0, 0], sizes = [3, 1], strides = [1, 1]} : vector<3x4xf32> to vector<3x1xf32>
    %4 = vector.extract_strided_slice %1 {offsets = [0, 0], sizes = [1, 256], strides = [1, 1]} : vector<4x256xf32> to vector<1x256xf32>
    %5 = vector.broadcast %3 : vector<3x1xf32> to vector<3x256xf32>
    %6 = vector.broadcast %4 : vector<1x256xf32> to vector<3x256xf32>
    %7 = arith.mulf %5, %6 : vector<3x256xf32>
    %8 = vector.extract_strided_slice %2 {offsets = [0, 1], sizes = [3, 1], strides = [1, 1]} : vector<3x4xf32> to vector<3x1xf32>
    %9 = vector.extract_strided_slice %1 {offsets = [1, 0], sizes = [1, 256], strides = [1, 1]} : vector<4x256xf32> to vector<1x256xf32>
    %10 = vector.broadcast %8 : vector<3x1xf32> to vector<3x256xf32>
    %11 = vector.broadcast %9 : vector<1x256xf32> to vector<3x256xf32>
    %12 = arith.mulf %10, %11 : vector<3x256xf32>
    %13 = arith.addf %7, %12 : vector<3x256xf32>
    %14 = vector.extract_strided_slice %2 {offsets = [0, 2], sizes = [3, 1], strides = [1, 1]} : vector<3x4xf32> to vector<3x1xf32>
    %15 = vector.extract_strided_slice %1 {offsets = [2, 0], sizes = [1, 256], strides = [1, 1]} : vector<4x256xf32> to vector<1x256xf32>
    %16 = vector.broadcast %14 : vector<3x1xf32> to vector<3x256xf32>
    %17 = vector.broadcast %15 : vector<1x256xf32> to vector<3x256xf32>
    %18 = arith.mulf %16, %17 : vector<3x256xf32>
    %19 = arith.addf %13, %18 : vector<3x256xf32>
    %20 = vector.extract_strided_slice %2 {offsets = [0, 3], sizes = [3, 1], strides = [1, 1]} : vector<3x4xf32> to vector<3x1xf32>
    %21 = vector.extract_strided_slice %1 {offsets = [3, 0], sizes = [1, 256], strides = [1, 1]} : vector<4x256xf32> to vector<1x256xf32>
    %22 = vector.broadcast %20 : vector<3x1xf32> to vector<3x256xf32>
    %23 = vector.broadcast %21 : vector<1x256xf32> to vector<3x256xf32>
    %24 = arith.mulf %22, %23 : vector<3x256xf32>
    %25 = arith.addf %19, %24 : vector<3x256xf32>
    %c0_4 = arith.constant 0 : index
    %c0_5 = arith.constant 0 : index
    %26 = vector.load %arg4[%c0_4, %c0_5] : memref<3x1xf32, #tpu.memory_space<vmem>>, vector<3x1xf32>
    %27 = vector.broadcast %26 : vector<3x1xf32> to vector<3x256xf32>
    %28 = arith.addf %25, %27 : vector<3x256xf32>
    %c0_6 = arith.constant 0 : index
    %c0_7 = arith.constant 0 : index
    %c0_8 = arith.constant 0 : index
    %29 = vector.load %arg5[%c0_6, %c0_7, %c0_8] : memref<1x3x256xf32, #tpu.memory_space<vmem>>, vector<1x3x256xf32>
    %30 = vector.shape_cast %29 : vector<1x3x256xf32> to vector<3x256xf32>
    %31 = vector.shape_cast %28 : vector<3x256xf32> to vector<1x3x256xf32>
    tpu.vector_store %arg5[%c0_6, %c0_7, %c0_8], %31 {strides = array<i32>} : memref<1x3x256xf32, #tpu.memory_space<vmem>>, vector<1x3x256xf32>,
    return
  }
  func.func @transform_0(%arg0: i32, %arg1: i32) -> (i32, i32, i32) {
    %c0_i32 = arith.constant 0 : i32
    %c0_i32_0 = arith.constant 0 : i32
    return %arg0, %c0_i32, %arg1 : i32, i32, i32
  }
  func.func @transform_1(%arg0: i32, %arg1: i32) -> (i32, i32) {
    %c0_i32 = arith.constant 0 : i32
    %c0_i32_0 = arith.constant 0 : i32
    %c0_i32_1 = arith.constant 0 : i32
    return %c0_i32, %c0_i32_0 : i32, i32
  }
  func.func @transform_2(%arg0: i32, %arg1: i32) -> (i32, i32) {
    %c0_i32 = arith.constant 0 : i32
    %c0_i32_0 = arith.constant 0 : i32
    %c0_i32_1 = arith.constant 0 : i32
    return %c0_i32, %c0_i32_0 : i32, i32
  }
  func.func @transform_3(%arg0: i32, %arg1: i32) -> (i32, i32, i32) {
    %c0_i32 = arith.constant 0 : i32
    %c0_i32_0 = arith.constant 0 : i32
    return %arg0, %c0_i32, %arg1 : i32, i32, i32
  }
}

</mosaic_0001>

<bundles_post_ra>
// kernel: tpu_custom_call.1
= control target key start
LH: loop header
LB: loop body
LE: loop exit
PB: predicated region body
PF: predicated region fallthrough
CT: control target
= control target key end

     0   :  { %8 = vsyncpa [#allocation3], 0  ;;  %s722_s0 = inlined_call_operand.hbm [shape: f32[2,4,256], index: 0, kind: input, shape index: {}]   ;;  %s723_s1 = inlined_call_operand.vmem [shape: f32[3,4], index: 1, kind: input, shape index: {}]   ;;  %s724_s2 = inlined_call_operand.vmem [shape: f32[3,1], index: 2, kind: input, shape index: {}]   ;;  %s725_s3 = inlined_call_operand.vmem [shape: f32[2,3,256], index: 3, kind: output, shape index: {}]  }
   0x1   :  { %10 = vsyncpa [#allocation3 + $0x1], 0  ;;  %s616_s12 = smov 0   ;;  %s618_s13 = smov 0  }
   0x2   :  { %s620_s14 = smov 0   ;;  %s622_s15 = smov 0  }
   0x3   :  { %s624_s16 = smov 0   ;;  %s626_s17 = smov 0  }
   0x4 LB: > { %s431_s18 = sadd.s32 4294967295, %s589_s17   ;;  %s28_s19 = sadd.s32 1, %s585_s16  ;;  %s589_s17 = sphi %s626_s17, %s16_s17   ;;  %s585_s16 = sphi %s624_s16, %s733_s16   ;;  %s581_s15 = sphi %s622_s15, %s732_s15   ;;  %s577_s14 = sphi %s620_s14, %s731_s14   ;;  %s573_s13 = sphi %s618_s13, %s730_s13   ;;  %s569_s12 = sphi %s616_s12, %s729_s12  }
   0x5   : > { %p30_p0 = scmp.ge.s32.totalorder %s28_s19, 2  ;;  %s37_s20 = sadd.s32 1, %s577_s14 }
   0x6   : > { %p44_p1 = scmp.ne.s32.totalorder %s577_s14, %s573_s13  ;;  %p45_p2 = scmp.eq.s32.totalorder %s589_s17, 0 }
   0x7   : > { %s735_s19 = smov (%p30_p0, %s28_s19), 0  ;;  %p50_p4 = scmp.ne.s32.totalorder %s573_s13, %s569_s12 }
   0x8   : > { %p652_p3 = por %p45_p2, %p44_p1  ;;  %s32_s22 = ssub.s32 %s585_s16, %s735_s19 }
   0x9   : > { %p51_p5 = scmp.eq.s32.totalorder %s431_s18, 0  ;;  %p35_p6 = scmp.eq.s32.totalorder %s32_s22, 0 }
   0xa   : > { %p452_p8 = scmp.lt.s32.totalorder %s589_s17, 2  ;;  %s150_s25 = sand.u32 1, %s577_s14  }
   0xb   : > { %p659_p7 = por %p51_p5, %p50_p4  ;;  %s444_s26 = sshll.u32 %s585_s16, 7 }
   0xc   : > { %s665_s24 = scalar_select %p35_p6, %s577_s14, %s37_s20  }
   0xd   : > { %s435_s27 = sshll.u32 %s150_s25, 3  ;;  %s162_s30 = scalar_lea.hbm %s722_s0, %s444_s26 }
   0xe   : > { %s154_s4 = scalar_lea.vmem [#allocation2], %s435_s27  ;;  %p674_p9 = pnand %p452_p8, %p652_p3 }
   0xf   : > { %s164_s5 = sshll.u32 %s154_s4, 4  ;;  %p438_p10 = scmp.ge.s32.totalorder %s589_s17, 1  ;;  %s165_s5 = int_to_ptr.vmem [resolvable:$true] %s164_s5 }
  0x10   : > { %p169_p11 = scmp.lt.s32.totalorder %s589_s17, 3  ;;  %s151_s7 = scalar_lea.sflag [#allocation3], %s150_s25 }
  0x11   : > { %p513_p12 = pneg %p674_p9  ;;  %s524_s8 = scalar_lea.vmem %s165_s5, 128 }
  0x12   : > { %p525_p13 = scmp.ne.s32.totalorder %s165_s5, %s524_s8  ;;  %s591_s9 = smov [#allocation2]  }
  0x13   : > { %s529_s10 = sshll.u32 %s591_s9, 4  ;;  %s530_s10 = int_to_ptr.vmem [resolvable:$false] %s529_s10 }
  0x14   : > { %p527_p0 = pnand %p525_p13, %p513_p12  ;;  %s531_s11 = scalar_lea.vmem %s530_s10, 256 }
  0x15   : > { %p532_p2 = scmp.lt.s32.totalorder %s165_s5, %s530_s10  ;;  %p533_p3 = scmp.lt.s32.totalorder %s531_s11, %s524_s8 }
  0x16   : > { %p528_p1 = pneg %p527_p0 }
  0x17   : > { %p534_p4 = por %p533_p3, %p532_p2 }
  0x19   : > { %p535_p5 = pnand %p534_p4, %p528_p1 }
  0x1b   : > { %538 = shalt.err (!%p535_p5)
}
  0x1c   : > { %451 = dma.hbm_to_vmem [thread:$0]  (!%p674_p9), %s162_s30, 128, %s165_s5, %s151_s7  }
  0x1d   : > { %p170_p6 = pnand %p438_p10, %p169_p11 }
  0x1e   : > { %s175_s12 = sand.u32 (!%p170_p6), 1, %s573_s13  }
  0x1f   : > { %173 = sbr.rel (%p170_p6) target bundleno = 181 (0xb5), region = 32  ;;  %s439_s18 = sshll.u32 (!%p170_p6), %s175_s12, 3 }
  0x20   : > { %s176_s20 = scalar_lea.sflag (!%p170_p6), [#allocation3], %s175_s12  ;;  %s179_s21 = scalar_lea.vmem (!%p170_p6), [#allocation2], %s439_s18 }
  0x24   : > { %564 = dma.done.wait (%p659_p7), %s176_s20, 128  }
  0x25   : > { %566 = vsyncadd (%p659_p7), %s176_s20, 4294967168  ;;  %v592_v0 = vmov 0   ;;  %v593_v1 = vmov 2   ;;  %v218_v2 = vld [vmem:[%s723_s1] sm:$0x7]  ;;  %v594_v3 = vmov 1   ;;  %v225_v6 = vlaneseq }
  0x26   : > { %505 = vset.pattern.permute.xlu0 %v592_v0  ;;  %507 = vset.pattern.permute.xlu1 %v593_v1  ;;  %v595_v4 = vmov 3   ;;  %v323_v5 = vld [vmem:[%s724_s2] sm:$0x7]  ;;  %p208_p7 = scmp.lt.s32.totalorder %s581_s15, 1 }
  0x27   : > { %221 = vperm.xlu0 %505, %v218_v2   ;;  %272 = vperm.xlu1 %507, %v218_v2   ;;  %v226_v7 = vshrl.u32 %v225_v6, 7  ;;  %v217_v12 = vld [vmem:[%s179_s21] sm:$0xff] }
  0x28   : > { %s737_s15 = smov (!%p208_p7, %s581_s15), 1 }
  0x29   : > { %v227_v8 = vsub.s32 0, %v226_v7  ;;  %v231_v9 = vsub.s32 4, %v226_v7  ;;  %v251_v10 = vsub.s32 1, %v226_v7  ;;  %v255_v11 = vsub.s32 5, %v226_v7  ;;  %s445_s23 = sshll.u32 %s737_s15, 3 }
  0x2a   : > { %v277_v13 = vsub.s32 2, %v226_v7  ;;  %v281_v14 = vsub.s32 6, %v226_v7  ;;  %v303_v15 = vsub.s32 3, %v226_v7  ;;  %v307_v16 = vsub.s32 7, %v226_v7  ;;  %s215_s30 = scalar_lea.vmem %s725_s3, %s445_s23 }
  0x2b   : > { %506 = vset.pattern.permute.xlu0 %v594_v3  ;;  %508 = vset.pattern.permute.xlu1 %v595_v4  ;;  %v228_v17 = vrot.slane %v217_v12, %v227_v8  ;;  %v232_v18 = vrot.slane %v217_v12, %v231_v9  ;;  %v252_v19 = vrot.slane %v217_v12, %v251_v10 }
  0x2c   : > { %246 = vperm.xlu0 %506, %v218_v2   ;;  %298 = vperm.xlu1 %508, %v218_v2   ;;  %v256_v20 = vrot.slane %v217_v12, %v255_v11  ;;  %v278_v21 = vrot.slane %v217_v12, %v277_v13  ;;  %v282_v22 = vrot.slane %v217_v12, %v281_v14 }
  0x2d   : > { %v304_v25 = vrot.slane %v217_v12, %v303_v15  ;;  %v308_v26 = vrot.slane %v217_v12, %v307_v16  ;;  %v238_v27 = vrot.slane %v228_v17, %v227_v8  ;;  %v242_v28 = vrot.slane %v232_v18, %v227_v8 }
  0x2e   : > { %v262_v29 = vrot.slane %v252_v19, %v251_v10  ;;  %v266_v30 = vrot.slane %v256_v20, %v251_v10  ;;  %v288_v31 = vrot.slane %v278_v21, %v277_v13  ;;  %v292_v32 = vrot.slane %v282_v22, %v277_v13 }
  0x2f   : > { %v314_v33 = vrot.slane %v304_v25, %v303_v15  ;;  %v318_v34 = vrot.slane %v308_v26, %v303_v15 }
  0x30   : > { %509 = vset.pattern.permute.xlu1 %v592_v0  ;;  %510 = vset.pattern.permute.xlu0 %v592_v0 }
  0x31   : > { %326 = vperm.xlu1 %509, %v323_v5  }
  0xa2   : > { %v222_v23 = vpop.permute.xlu0 %221  ;;  %v273_v24 = vpop.permute.xlu1 %272 }
  0xa3   : > { %v243_v37 = vmul.f32 %v238_v27, %v222_v23  ;;  %v244_v38 = vmul.f32 %v242_v28, %v222_v23  ;;  %v293_v41 = vmul.f32 %v288_v31, %v273_v24  ;;  %v294_v42 = vmul.f32 %v292_v32, %v273_v24 }
  0xa7   : > { %v247_v35 = vpop.permute.xlu0 %246  ;;  %v299_v36 = vpop.permute.xlu1 %298 }
  0xa8   : > { %v267_v39 = vmul.f32 %v262_v29, %v247_v35  ;;  %v268_v40 = vmul.f32 %v266_v30, %v247_v35  ;;  %v319_v45 = vmul.f32 %v314_v33, %v299_v36  ;;  %v320_v46 = vmul.f32 %v318_v34, %v299_v36 }
  0xaa   : > { %v269_v43 = vadd.f32 %v267_v39, %v243_v37  ;;  %v270_v44 = vadd.f32 %v268_v40, %v244_v38 }
  0xac   : > { %v295_v47 = vadd.f32 %v293_v41, %v269_v43  ;;  %v296_v48 = vadd.f32 %v294_v42, %v270_v44  ;;  %v327_v49 = vpop.permute.xlu1 %326 }
  0xae   : > { %v321_v50 = vadd.f32 %v319_v45, %v295_v47  ;;  %v322_v51 = vadd.f32 %v320_v46, %v296_v48 }
  0xb0   : > { %v329_v52 = vadd.f32 %v327_v49, %v321_v50  ;;  %v330_v53 = vadd.f32 %v327_v49, %v322_v51 }
  0xb2   : > { %v333_v54 = vcombine.low %v329_v52, %v330_v53 }
  0xb4   : > { %335 = vst [vmem:[%s215_s30] sm:$0x77] %v333_v54 }
  0xb5 PF: > { %s16_s17 = sadd.s32 1, %s589_s17   ;;  %s729_s12 = smov %s573_s13 }
  0xb6   : > { %p13_p8 = scmp.ge.s32.totalorder %s16_s17, 4   ;;  %s730_s13 = smov %s577_s14 }
  0xb7   : > { %s731_s14 = smov %s665_s24  ;;  %s732_s15 = smov %s585_s16 }
  0xb8   : > { %s733_s16 = smov %s735_s19  ;;  %15 = sbr.rel (!%p13_p8) target bundleno = 4 (0x4), region = 72 }
  0xbd   :  { %366 = vsyncpa [#allocation3], 1 }
  0xbe   :  { %368 = vsyncpa [#allocation3 + $0x1], 1 }

</bundles_post_ra>
